<compile_context>
chip_gen: v6e
topology: v6e:2x2x1
jax: 0.10.0
libtpu: 0.0.40
codegen_flags: <defaults>
</compile_context>

<pallas_src>
import functools

import jax
import jax.numpy as jnp
from jax import lax
from jax.experimental import pallas as pl
from jax.experimental.pallas import tpu as pltpu

GROUPS = 120   # hard-coded in CC_Block.__init__ (groups=120)
BN_EPS = 1e-5  # nn.BatchNorm2d default


def _cc_block_kernel(x_ref, wb_ref, o_ref, *, width, ksize):
    """Depthwise (1, ksize) conv along W with folded BatchNorm affine.

    x_ref:  (Nb, C, HWb) input block (lane-dense flat spatial layout, HWb % W == 0)
    wb_ref: (C, ksize+1)  BN-folded per-channel taps (cols 0..K-1) and bias (col K)
    o_ref:  (Nb, C, HWb)
    """
    pad = ksize // 2
    hw = x_ref.shape[-1]

    x = x_ref[...].astype(jnp.float32)

    # Position of each flat-HW lane inside its W-row (block starts on a W-row
    # boundary, so a plain modulo is exact).  The conv must not leak across rows.
    wpos = lax.broadcasted_iota(jnp.int32, (1, 1, hw), 2) % width

    # Center tap + folded bias first (no shift / no mask needed).
    acc = x * wb_ref[:, pad:pad + 1] + wb_ref[:, ksize:ksize + 1]

    for t in range(ksize):                       # static, unrolled (ksize == 3)
        off = t - pad
        if off == 0:
            continue
        # xs[..., j] = x[..., j + off]; XLU lane rotate (shift made non-negative).
        xs = pltpu.roll(x, shift=(-off) % hw, axis=2)
        # Zero taps that would cross a W-row boundary: need 0 <= wpos + off < width.
        valid = (wpos >= -off) & (wpos < width - off)
        xs = jnp.where(valid, xs, 0.0)
        # (C, 1) per-channel tap broadcasts over (Nb, C, HWb): pure VPU MAC.
        acc = acc + wb_ref[:, t:t + 1] * xs

    o_ref[...] = acc.astype(o_ref.dtype)


def _scoped_vmem_limit_bytes():
    """Per-generation scoped-VMEM limit: ~half of physical VMEM, capped at 64 MiB.

    v5e/v6e (128 MiB physical) -> 64 MiB; v7x (64 MiB physical) -> 32 MiB.
    Falls back to a conservative 32 MiB if the hardware query is unavailable.
    """
    try:
        cap = pltpu.get_tpu_info().vmem_capacity_bytes
        return int(max(32 << 20, min(cap // 2, 64 << 20)))
    except Exception:
        return 32 << 20


def cc_block_forward(x, conv_w, conv_b, bn_gamma, bn_beta, bn_mean, bn_var,
                     *, eps=BN_EPS):
    """CC_Block forward (default config: depthwise (1,K) conv + eval BatchNorm).

    x:      (N, C, H, W) with C == GROUPS (depthwise grouped conv).  bf16 or f32;
            I/O stays in x.dtype, accumulation is f32.
    conv_w: (C, 1, 1, K); conv_b: (C,)
    bn_*:   (C,) BatchNorm2d affine params / running statistics (eval mode)
    """
    N, C, H, W = x.shape
    assert C == GROUPS and conv_w.shape[0] == C and conv_w.shape[1] == 1
    K = conv_w.shape[-1]
    HW = H * W

    # Fold BatchNorm (eval) into the conv:  y = conv_raw(x) * scale + shift,
    # packed as one (C, K+1) operand: columns 0..K-1 = taps, column K = bias.
    scale = bn_gamma / jnp.sqrt(bn_var + eps)                                  # (C,)
    w_eff = conv_w.reshape(C, K) * scale[:, None]                              # (C, K)
    b_eff = (conv_b - bn_mean) * scale + bn_beta                               # (C,)
    wb = jnp.concatenate([w_eff, b_eff[:, None]], axis=1).astype(jnp.float32)  # (C, K+1)

    # Lane-dense HBM view (free contiguous reshape, no extra HBM traffic).
    x_flat = x.reshape(N, C, HW)

    # --- block sizing --------------------------------------------------------
    vmem_limit = _scoped_vmem_limit_bytes()
    budget = (vmem_limit * 3) // 4  # headroom for Mosaic internal scratch
    itemsize = x.dtype.itemsize

    def block_bytes(nb, hw_blk):
        # double-buffered input + output blocks (4 * itemsize per element) plus
        # ~3 block-sized f32 temporaries live in the body (x_f32, rolled, acc).
        return nb * C * hw_blk * (4 * itemsize + 3 * 4)

    # H-tiling fallback: split the flat H*W axis at W-row boundaries when a
    # single sample does not fit the budget (conv is along W only -> no halo).
    hw_blk = HW
    if block_bytes(1, HW) > budget:
        divisors = [d for d in range(1, H + 1) if H % d == 0]
        fitting = [d for d in divisors if block_bytes(1, d * W) <= budget]
        if fitting:
            aligned = [d for d in fitting if (d * W) % 128 == 0]
            h_blk = max(aligned) if aligned else max(fitting)
        else:
            h_blk = 1  # minimum block; rely on vmem_limit headroom
        hw_blk = h_blk * W
    n_hw_blocks = HW // hw_blk

    # Batch as many samples per grid step as fit the budget (ragged last block
    # is handled by the cdiv grid; no divisibility search).
    if hw_blk == HW:
        nb = max(1, min(N, budget // max(1, block_bytes(1, HW))))
    else:
        nb = 1
    # Keep >= 2 independent grid steps whenever possible so v7x can shard the
    # "parallel" axes across both TensorCores.
    if pl.cdiv(N, nb) * n_hw_blocks < 2 and N >= 2:
        nb = (N + 1) // 2
    grid = (pl.cdiv(N, nb), n_hw_blocks)

    out_flat = pl.pallas_call(
        functools.partial(_cc_block_kernel, width=W, ksize=K),
        out_shape=jax.ShapeDtypeStruct((N, C, HW), x.dtype),
        grid_spec=pltpu.PrefetchScalarGridSpec(
            num_scalar_prefetch=0,
            grid=grid,
            in_specs=[
                pl.BlockSpec((nb, C, hw_blk), lambda n, h: (n, 0, h)),
                pl.BlockSpec((C, K + 1), lambda n, h: (0, 0)),
            ],
            out_specs=pl.BlockSpec((nb, C, hw_blk), lambda n, h: (n, 0, h)),
        ),
        compiler_params=pltpu.CompilerParams(
            # all grid steps are independent -> both axes shardable across TCs
            dimension_semantics=("parallel", "parallel"),
            vmem_limit_bytes=vmem_limit,
        ),
    )(x_flat, wb)

    return out_flat.reshape(N, C, H, W)


def ref_forward(x, conv_w, conv_b, bn_gamma, bn_beta, bn_mean, bn_var, eps=BN_EPS):
    """Pure-JAX reference reproducing CC_Block.forward (default config, eval BN)."""
    N, C, H, W = x.shape
    K = conv_w.shape[-1]
    dn = ("NCHW", "OIHW", "NCHW")
    y = lax.conv_general_dilated(
        x, conv_w, window_strides=(1, 1),
        padding=((0, 0), (K // 2, K // 2)),
        dimension_numbers=dn, feature_group_count=C,
        precision=lax.Precision.HIGHEST)
    y = y + conv_b[None, :, None, None]
    y = (y - bn_mean[None, :, None, None]) / jnp.sqrt(bn_var[None, :, None, None] + eps)
    return y * bn_gamma[None, :, None, None] + bn_beta[None, :, None, None]


if __name__ == "__main__":
    # groups=120 is hard-coded in the module, so channels must be 120.
    N, C, H, W, K = 4, GROUPS, 8, 16, 3
    key = jax.random.PRNGKey(0)
    k = jax.random.split(key, 7)

    x = jax.random.normal(k[0], (N, C, H, W), jnp.float32)
    conv_w = jax.random.normal(k[1], (C, 1, 1, K), jnp.float32) * 0.3   # conv.weight
    conv_b = jax.random.normal(k[2], (C,), jnp.float32) * 0.1           # conv.bias
    bn_gamma = 1.0 + 0.1 * jax.random.normal(k[3], (C,), jnp.float32)
    bn_beta = 0.1 * jax.random.normal(k[4], (C,), jnp.float32)
    bn_mean = 0.1 * jax.random.normal(k[5], (C,), jnp.float32)
    bn_var = jax.random.uniform(k[6], (C,), jnp.float32, minval=0.5, maxval=1.5)

    out = jax.block_until_ready(
        cc_block_forward(x, conv_w, conv_b, bn_gamma, bn_beta, bn_mean, bn_var))
    ref = ref_forward(x, conv_w, conv_b, bn_gamma, bn_beta, bn_mean, bn_var)

    assert out.shape == x.shape
    err = float(jnp.max(jnp.abs(out - ref)))
    assert jnp.allclose(out, ref, rtol=1e-4, atol=1e-4), f"max abs err = {err}"
    print("KERNEL_OK")
</pallas_src>

<mosaic_0001>
module attributes {stable_mosaic.version = 11 : i64} {
  func.func @_cc_block_kernel(%arg0: i32, %arg1: i32, %arg2: memref<2x120x128xf32, #tpu.memory_space<vmem>>, %arg3: memref<120x4xf32, #tpu.memory_space<vmem>>, %arg4: memref<2x120x128xf32, #tpu.memory_space<vmem>>) attributes {dimension_semantics = [#tpu.dimension_semantics<parallel>, #tpu.dimension_semantics<parallel>], iteration_bounds = array<i64: 2, 1>, scalar_prefetch = 0 : i64, scratch_operands = 0 : i64, tpu.core_type = #tpu.core_type<tc>, window_params = [{transform_indices = @transform_0, window_bounds = array<i64: 2, 120, 128>}, {pipeline_mode = #tpu.pipeline_mode<synchronous>, transform_indices = @transform_1, window_bounds = array<i64: 120, 4>}, {transform_indices = @transform_2, window_bounds = array<i64: 2, 120, 128>}]} {
    %c0 = arith.constant 0 : index
    %c0_0 = arith.constant 0 : index
    %c0_1 = arith.constant 0 : index
    %0 = vector.load %arg2[%c0, %c0_0, %c0_1] : memref<2x120x128xf32, #tpu.memory_space<vmem>>, vector<2x120x128xf32>
    %1 = tpu.iota {dimensions = array<i32: 2>} : vector<1x1x128xi32>
    %c16_i32 = arith.constant 16 : i32
    %c0_i32 = arith.constant 0 : i32
    %2 = arith.cmpi eq, %c16_i32, %c0_i32 : i32
    %c1_i32 = arith.constant 1 : i32
    %3 = arith.select %2, %c1_i32, %c16_i32 : i32
    %4 = vector.broadcast %3 : i32 to vector<1x1x128xi32>
    %5 = arith.remsi %1, %4 : vector<1x1x128xi32>
    %c0_i32_2 = arith.constant 0 : i32
    %6 = vector.broadcast %c0_i32_2 : i32 to vector<1x1x128xi32>
    %7 = arith.cmpi ne, %5, %6 : vector<1x1x128xi32>
    %c0_i32_3 = arith.constant 0 : i32
    %8 = vector.broadcast %c0_i32_3 : i32 to vector<1x1x128xi32>
    %9 = arith.cmpi slt, %5, %8 : vector<1x1x128xi32>
    %c0_i32_4 = arith.constant 0 : i32
    %10 = arith.cmpi slt, %3, %c0_i32_4 : i32
    %11 = vector.broadcast %10 : i1 to vector<1x1x128xi1>
    %12 = vector.broadcast %11 : vector<1x1x128xi1> to vector<1x1x128xi1>
    %13 = arith.xori %9, %12 : vector<1x1x128xi1>
    %14 = arith.andi %13, %7 : vector<1x1x128xi1>
    %15 = vector.broadcast %3 : i32 to vector<1x1x128xi32>
    %16 = arith.addi %5, %15 : vector<1x1x128xi32>
    %17 = arith.select %14, %16, %5 : vector<1x1x128xi1>, vector<1x1x128xi32>
    %c0_5 = arith.constant 0 : index
    %c1 = arith.constant 1 : index
    %18 = vector.load %arg3[%c0_5, %c1] : memref<120x4xf32, #tpu.memory_space<vmem>>, vector<120x1xf32>
    %19 = vector.shape_cast %18 : vector<120x1xf32> to vector<1x120x1xf32>
    %20 = vector.broadcast %19 : vector<1x120x1xf32> to vector<2x120x128xf32>
    %21 = arith.mulf %0, %20 : vector<2x120x128xf32>
    %c0_6 = arith.constant 0 : index
    %c3 = arith.constant 3 : index
    %22 = vector.load %arg3[%c0_6, %c3] : memref<120x4xf32, #tpu.memory_space<vmem>>, vector<120x1xf32>
    %23 = vector.shape_cast %22 : vector<120x1xf32> to vector<1x120x1xf32>
    %24 = vector.broadcast %23 : vector<1x120x1xf32> to vector<2x120x128xf32>
    %25 = arith.addf %21, %24 : vector<2x120x128xf32>
    %c1_i32_7 = arith.constant 1 : i32
    %26 = tpu.dynamic_rotate %0 by %c1_i32_7 dim 2 : vector<2x120x128xf32>, i32 -> vector<2x120x128xf32>
    %c1_i32_8 = arith.constant 1 : i32
    %27 = vector.broadcast %c1_i32_8 : i32 to vector<1x1x128xi32>
    %28 = arith.cmpi sge, %17, %27 : vector<1x1x128xi32>
    %c17_i32 = arith.constant 17 : i32
    %29 = vector.broadcast %c17_i32 : i32 to vector<1x1x128xi32>
    %30 = arith.cmpi slt, %17, %29 : vector<1x1x128xi32>
    %31 = arith.andi %28, %30 : vector<1x1x128xi1>
    %cst = arith.constant 0.000000e+00 : f32
    %32 = vector.shape_cast %31 : vector<1x1x128xi1> to vector<1x1x128xi1>
    %33 = vector.broadcast %32 : vector<1x1x128xi1> to vector<2x120x128xi1>
    %34 = vector.broadcast %cst : f32 to vector<2x120x128xf32>
    %35 = arith.select %33, %26, %34 : vector<2x120x128xi1>, vector<2x120x128xf32>
    %c0_9 = arith.constant 0 : index
    %c0_10 = arith.constant 0 : index
    %36 = vector.load %arg3[%c0_9, %c0_10] : memref<120x4xf32, #tpu.memory_space<vmem>>, vector<120x1xf32>
    %37 = vector.shape_cast %36 : vector<120x1xf32> to vector<1x120x1xf32>
    %38 = vector.broadcast %37 : vector<1x120x1xf32> to vector<2x120x128xf32>
    %39 = arith.mulf %38, %35 : vector<2x120x128xf32>
    %40 = arith.addf %25, %39 : vector<2x120x128xf32>
    %c127_i32 = arith.constant 127 : i32
    %41 = tpu.dynamic_rotate %0 by %c127_i32 dim 2 : vector<2x120x128xf32>, i32 -> vector<2x120x128xf32>
    %c-1_i32 = arith.constant -1 : i32
    %42 = vector.broadcast %c-1_i32 : i32 to vector<1x1x128xi32>
    %43 = arith.cmpi sge, %17, %42 : vector<1x1x128xi32>
    %c15_i32 = arith.constant 15 : i32
    %44 = vector.broadcast %c15_i32 : i32 to vector<1x1x128xi32>
    %45 = arith.cmpi slt, %17, %44 : vector<1x1x128xi32>
    %46 = arith.andi %43, %45 : vector<1x1x128xi1>
    %cst_11 = arith.constant 0.000000e+00 : f32
    %47 = vector.shape_cast %46 : vector<1x1x128xi1> to vector<1x1x128xi1>
    %48 = vector.broadcast %47 : vector<1x1x128xi1> to vector<2x120x128xi1>
    %49 = vector.broadcast %cst_11 : f32 to vector<2x120x128xf32>
    %50 = arith.select %48, %41, %49 : vector<2x120x128xi1>, vector<2x120x128xf32>
    %c0_12 = arith.constant 0 : index
    %c2 = arith.constant 2 : index
    %51 = vector.load %arg3[%c0_12, %c2] : memref<120x4xf32, #tpu.memory_space<vmem>>, vector<120x1xf32>
    %52 = vector.shape_cast %51 : vector<120x1xf32> to vector<1x120x1xf32>
    %53 = vector.broadcast %52 : vector<1x120x1xf32> to vector<2x120x128xf32>
    %54 = arith.mulf %53, %50 : vector<2x120x128xf32>
    %55 = arith.addf %40, %54 : vector<2x120x128xf32>
    %c0_13 = arith.constant 0 : index
    %c0_14 = arith.constant 0 : index
    %c0_15 = arith.constant 0 : index
    %56 = vector.load %arg4[%c0_13, %c0_14, %c0_15] : memref<2x120x128xf32, #tpu.memory_space<vmem>>, vector<2x120x128xf32>
    tpu.vector_store %arg4[%c0_13, %c0_14, %c0_15], %55 {strides = array<i32>} : memref<2x120x128xf32, #tpu.memory_space<vmem>>, vector<2x120x128xf32>,
    return
  }
  func.func @transform_0(%arg0: i32, %arg1: i32) -> (i32, i32, i32) {
    %c0_i32 = arith.constant 0 : i32
    %c0_i32_0 = arith.constant 0 : i32
    return %arg0, %c0_i32, %arg1 : i32, i32, i32
  }
  func.func @transform_1(%arg0: i32, %arg1: i32) -> (i32, i32) {
    %c0_i32 = arith.constant 0 : i32
    %c0_i32_0 = arith.constant 0 : i32
    %c0_i32_1 = arith.constant 0 : i32
    return %c0_i32, %c0_i32_0 : i32, i32
  }
  func.func @transform_2(%arg0: i32, %arg1: i32) -> (i32, i32, i32) {
    %c0_i32 = arith.constant 0 : i32
    %c0_i32_0 = arith.constant 0 : i32
    return %arg0, %c0_i32, %arg1 : i32, i32, i32
  }
}

</mosaic_0001>

<bundles_post_ra>
// kernel: tpu_custom_call.1
= control target key start
LH: loop header
LB: loop body
LE: loop exit
PB: predicated region body
PF: predicated region fallthrough
CT: control target
= control target key end

     0   :  { %7 = vsyncpa [#allocation3], 0  ;;  %s2289_s0 = inlined_call_operand.hbm [shape: f32[4,120,128], index: 0, kind: input, shape index: {}]   ;;  %s2290_s1 = inlined_call_operand.vmem [shape: f32[120,4], index: 1, kind: input, shape index: {}]   ;;  %s2291_s2 = inlined_call_operand.hbm [shape: f32[4,120,128], index: 2, kind: output, shape index: {}]  }
   0x1   :  { %9 = vsyncpa [#allocation3 + $0x1], 0 }
   0x2   :  { %10 = vsyncpa [#allocation4], 0 }
   0x3   :  { %12 = vsyncpa [#allocation4 + $0x1], 0  ;;  %s1231_s9 = smov 0   ;;  %s1233_s10 = smov 0  }
   0x4   :  { %s1235_s11 = smov 0   ;;  %s1237_s12 = smov 0  }
   0x5   :  { %s1239_s13 = smov 0   ;;  %s1241_s14 = smov 0  }
   0x6 LB: > { %s997_s15 = sadd.s32 4294967295, %s1202_s14   ;;  %s998_s16 = sadd.s32 4294967294, %s1202_s14   ;;  %s1202_s14 = sphi %s1241_s14, %s18_s14   ;;  %s1198_s13 = sphi %s1239_s13, %s2457_s13   ;;  %s1194_s12 = sphi %s1237_s12, %s2456_s12   ;;  %s1190_s11 = sphi %s1235_s11, %s2455_s11   ;;  %s1186_s10 = sphi %s1233_s10, %s2454_s10   ;;  %s1182_s9 = sphi %s1231_s9, %s2453_s9  }
   0x7   : > { %s30_s17 = sadd.s32 1, %s1198_s13  ;;  %s39_s18 = sadd.s32 1, %s1190_s11 }
   0x8   : > { %p32_p0 = scmp.ge.s32.totalorder %s30_s17, 2  ;;  %p46_p1 = scmp.ne.s32.totalorder %s1190_s11, %s1186_s10 }
   0x9   : > { %p47_p2 = scmp.eq.s32.totalorder %s1202_s14, 0  ;;  %p52_p3 = scmp.ne.s32.totalorder %s1186_s10, %s1182_s9 }
   0xa   : > { %s2459_s17 = smov (%p32_p0, %s30_s17), 0  ;;  %p53_p5 = scmp.eq.s32.totalorder %s997_s15, 0 }
   0xb   : > { %p1272_p4 = por %p47_p2, %p46_p1  ;;  %s34_s20 = ssub.s32 %s1198_s13, %s2459_s17 }
   0xc   : > { %p99_p6 = scmp.eq.s32.totalorder %s997_s15, 1  ;;  %p37_p7 = scmp.eq.s32.totalorder %s34_s20, 0 }
   0xd   : > { %p1278_p8 = por %p53_p5, %p52_p3  ;;  %p105_p10 = scmp.eq.s32.totalorder %s998_s16, 1 }
   0xe   : > { %p1282_p9 = por %p99_p6, %p46_p1  ;;  %p1026_p13 = scmp.lt.s32.totalorder %s1202_s14, 2 }
   0xf   : > { %s1287_s23 = scalar_select %p37_p7, %s1190_s11, %s39_s18  }
  0x10   : > { %p1289_p11 = por %p105_p10, %p52_p3  ;;  %s128_s25 = sand.u32 1, %s1190_s11  }
  0x11   : > { %s1010_s26 = smul.u32 240, %s128_s25  ;;  %p1299_p0 = pnand %p1026_p13, %p1272_p4 }
  0x12   : > { %s1011_s27 = smul.u32 3840, %s1198_s13  ;;  %p1004_p1 = scmp.ge.s32.totalorder %s1202_s14, 1 }
  0x13   : > { %s132_s4 = scalar_lea.vmem [#allocation2], %s1010_s26  ;;  %s129_s6 = scalar_lea.sflag [#allocation3], %s128_s25 }
  0x14   : > { %s140_s3 = scalar_lea.hbm %s2289_s0, %s1011_s27  ;;  %s141_s5 = sshll.u32 %s132_s4, 4  ;;  %s142_s5 = int_to_ptr.vmem [resolvable:$true] %s141_s5 }
  0x15   : > { %p1096_p2 = pneg %p1299_p0  ;;  %s1107_s7 = scalar_lea.vmem %s142_s5, 3840 }
  0x16   : > { %p1108_p3 = scmp.ne.s32.totalorder %s142_s5, %s1107_s7  ;;  %s1204_s8 = smov [#allocation2]  }
  0x17   : > { %s1112_s15 = sshll.u32 %s1204_s8, 4  ;;  %s1113_s15 = int_to_ptr.vmem [resolvable:$false] %s1112_s15 }
  0x18   : > { %p1110_p5 = pnand %p1108_p3, %p1096_p2  ;;  %s1114_s16 = scalar_lea.vmem %s1113_s15, 7680 }
  0x19   : > { %p1115_p4 = scmp.lt.s32.totalorder %s142_s5, %s1113_s15  ;;  %p1116_p7 = scmp.lt.s32.totalorder %s1114_s16, %s1107_s7 }
  0x1a   : > { %p1111_p6 = pneg %p1110_p5 }
  0x1b   : > { %p1117_p10 = por %p1116_p7, %p1115_p4 }
  0x1d   : > { %p1118_p13 = pnand %p1117_p10, %p1111_p6 }
  0x1f   : > { %1121 = shalt.err (!%p1118_p13)
}
  0x20   : > { %s1205_s18 = smov 128   ;;  %s1206_s19 = smov 8  }
  0x21   : > { %1021 = dma.hbm_to_vmem [thread:$0]  (!%p1299_p0), %s140_s3, 3840, %s142_s5, %s129_s6, %s1205_s18, %s1205_s18, %s1206_s19  }
  0x22   : > { %p149_p12 = scmp.lt.s32.totalorder %s1202_s14, 3 }
  0x24   : > { %p150_p2 = pnand %p1004_p1, %p149_p12 }
  0x26   : > { %153 = sbr.rel (%p150_p2) target bundleno = 434 (0x1b2), region = 28 }
  0x2b   : > { %s1315_s20 = sand.u32 1, %s1186_s10  }
  0x2c   : > { %s1012_s25 = smul.u32 240, %s1315_s20  ;;  %s156_s26 = scalar_lea.sflag [#allocation3], %s1315_s20 }
  0x2e   : > { %s1321_s27 = scalar_lea.vmem [#allocation2], %s1012_s25 }
  0x2f   : > { %1173 = dma.done.wait (%p1278_p8), %s156_s26, 3840  }
  0x30   : > { %1175 = vsyncadd (%p1278_p8), %s156_s26, 4294963456  ;;  %v1207_v0 = vmov 1   ;;  %v1330_v1 = vld [vmem:[%s2290_s1 + $0x10] sm:$0xff]  ;;  %v1335_v2 = vld [vmem:[%s2290_s1] sm:$0xff]  ;;  %v1208_v16 = vmov 3   ;;  %s1209_s28 = smov 1  }
  0x31   : > { %1087 = vset.pattern.permute.xlu1 %v1207_v0  ;;  %1086 = vset.pattern.permute.xlu0 %v1207_v0  ;;  %v1342_v3 = vld [vmem:[%s2290_s1 + $0x18] sm:$0xff]  ;;  %v1347_v4 = vld [vmem:[%s2290_s1 + $0x8] sm:$0xff]  ;;  %v1359_v6 = vld [vmem:[%s2290_s1 + $0x20] sm:$0xff]  ;;  %v1210_v21 = vmov 0   ;;  %v1212_v62 = vmov 2   ;;  %s2094_s29 = scalar_lea.vmem [#allocation5], %s1012_s25 }
  0x32   : > { %253 = vperm.xlu1 %1087, %v1330_v1   ;;  %243 = vperm.xlu0 %1086, %v1335_v2   ;;  %v1354_v5 = vld [vmem:[%s2290_s1 + $0x28] sm:$0xff]  ;;  %v1366_v7 = vld [vmem:[%s2290_s1 + $0x38] sm:$0xff]  ;;  %v1371_v8 = vld [vmem:[%s2290_s1 + $0x30] sm:$0xff]  ;;  %s1013_s25 = smul.u32 3840, %s1194_s12  ;;  %s912_s30 = sshll.u32 %s2094_s29, 4  ;;  %s2239_s30 = int_to_ptr.vmem [resolvable:$true] %s912_s30 }
  0x33   : > { %v1378_v9 = vld [vmem:[%s2290_s1 + $0x48] sm:$0xff]  ;;  %v1383_v10 = vld [vmem:[%s2290_s1 + $0x40] sm:$0xff]  ;;  %v1390_v11 = vld [vmem:[%s2290_s1 + $0x58] sm:$0xff]  ;;  %s897_s12 = scalar_lea.sflag [#allocation4], %s1315_s20  ;;  %s1122_s5 = scalar_lea.vmem %s2239_s30, 3840 }
  0x34   : > { %v1395_v12 = vld [vmem:[%s2290_s1 + $0x50] sm:$0xff]  ;;  %v1402_v13 = vld [vmem:[%s2290_s1 + $0x68] sm:$0xff]  ;;  %v1407_v14 = vld [vmem:[%s2290_s1 + $0x60] sm:$0xff]  ;;  %s2237_s21 = scalar_lea.hbm %s2291_s2, %s1013_s25  ;;  %p1123_p8 = scmp.ne.s32.totalorder %s2239_s30, %s1122_s5 }
  0x35   : > { %v1414_v15 = vld [vmem:[%s2290_s1 + $0x70] sm:$0xff]  ;;  %v1433_v17 = vld [vmem:[%s1321_s27 + $0x8] sm:$0xff]  ;;  %v1443_v19 = vld [vmem:[%s1321_s27 + $0x18] sm:$0xff]  ;;  %s1213_s6 = smov [#allocation5]  }
  0x36   : > { %258 = vperm.xlu1 %1087, %v1342_v3   ;;  %248 = vperm.xlu0 %1086, %v1347_v4   ;;  %2331 = vst [vmem:[#allocation8_spill] sm:$0xff] %v1433_v17  ;;  %v1436_v18 = vld [vmem:[%s1321_s27] sm:$0xff]  ;;  %2333 = vst [vmem:[#allocation10_spill] sm:$0xff] %v1443_v19  ;;  %v1446_v20 = vld [vmem:[%s1321_s27 + $0x10] sm:$0xff]  ;;  %p1124_p12 = pnand %p1123_p8, %p1282_p9  ;;  %s1126_s7 = sshll.u32 %s1213_s6, 4  ;;  %s1127_s7 = int_to_ptr.vmem [resolvable:$false] %s1126_s7 }
  0x37   : > { %2332 = vst [vmem:[#allocation9_spill] sm:$0xff] %v1436_v18  ;;  %2334 = vst [vmem:[#allocation11_spill] sm:$0xff] %v1446_v20  ;;  %v1453_v22 = vld [vmem:[%s1321_s27 + $0x28] sm:$0xff]  ;;  %v1456_v23 = vld [vmem:[%s1321_s27 + $0x20] sm:$0xff]  ;;  %s1128_s8 = scalar_lea.vmem %s1127_s7, 7680  ;;  %p1129_p1 = scmp.lt.s32.totalorder %s2239_s30, %s1127_s7 }
  0x38   : > { %2335 = vst [vmem:[#allocation12_spill] sm:$0xff] %v1453_v22  ;;  %2336 = vst [vmem:[#allocation13_spill] sm:$0xff] %v1456_v23  ;;  %v1463_v24 = vld [vmem:[%s1321_s27 + $0x38] sm:$0xff]  ;;  %v1466_v25 = vld [vmem:[%s1321_s27 + $0x30] sm:$0xff]  ;;  %p1125_p0 = pneg %p1124_p12  ;;  %p1130_p3 = scmp.lt.s32.totalorder %s1128_s8, %s1122_s5 }
  0x39   : > { %2337 = vst [vmem:[#allocation14_spill] sm:$0xff] %v1463_v24  ;;  %v1473_v26 = vld [vmem:[%s1321_s27 + $0x48] sm:$0xff]  ;;  %v1476_v27 = vld [vmem:[%s1321_s27 + $0x40] sm:$0xff]  ;;  %v1483_v28 = vld [vmem:[%s1321_s27 + $0x58] sm:$0xff] }
  0x3a   : > { %268 = vperm.xlu1 %1087, %v1354_v5   ;;  %263 = vperm.xlu0 %1086, %v1359_v6   ;;  %v1486_v29 = vld [vmem:[%s1321_s27 + $0x50] sm:$0xff]  ;;  %v1493_v30 = vld [vmem:[%s1321_s27 + $0x68] sm:$0xff]  ;;  %v1496_v31 = vld [vmem:[%s1321_s27 + $0x60] sm:$0xff]  ;;  %p1131_p5 = por %p1130_p3, %p1129_p1 }
  0x3b   : > { %2338 = vst [vmem:[#allocation15_spill] sm:$0xff] %v1493_v30  ;;  %v1503_v32 = vld [vmem:[%s1321_s27 + $0x78] sm:$0xff]  ;;  %v1506_v33 = vld [vmem:[%s1321_s27 + $0x70] sm:$0xff]  ;;  %v1513_v34 = vld [vmem:[%s1321_s27 + $0x88] sm:$0xff] }
  0x3c   : > { %2339 = vst [vmem:[#allocation16_spill] sm:$0xff] %v1503_v32  ;;  %2340 = vst [vmem:[#allocation17_spill] sm:$0xff] %v1513_v34  ;;  %v1516_v35 = vld [vmem:[%s1321_s27 + $0x80] sm:$0xff]  ;;  %v1523_v36 = vld [vmem:[%s1321_s27 + $0x98] sm:$0xff]  ;;  %p1132_p6 = pnand %p1131_p5, %p1125_p0 }
  0x3d   : > { %2341 = vst [vmem:[#allocation18_spill] sm:$0xff] %v1516_v35  ;;  %2342 = vst [vmem:[#allocation19_spill] sm:$0xff] %v1523_v36  ;;  %v1526_v37 = vld [vmem:[%s1321_s27 + $0x90] sm:$0xff]  ;;  %v1533_v38 = vld [vmem:[%s1321_s27 + $0xa8] sm:$0xff] }
  0x3e   : > { %278 = vperm.xlu1 %1087, %v1366_v7   ;;  %273 = vperm.xlu0 %1086, %v1371_v8   ;;  %2343 = vst [vmem:[#allocation20_spill] sm:$0xff] %v1526_v37  ;;  %v1536_v39 = vld [vmem:[%s1321_s27 + $0xa0] sm:$0xff]  ;;  %v1543_v40 = vld [vmem:[%s1321_s27 + $0xb8] sm:$0xff]  ;;  %v1546_v41 = vld [vmem:[%s1321_s27 + $0xb0] sm:$0xff] }
  0x3f   : > { %2344 = vst [vmem:[#allocation21_spill] sm:$0xff] %v1536_v39  ;;  %2345 = vst [vmem:[#allocation22_spill] sm:$0xff] %v1546_v41  ;;  %v1553_v42 = vld [vmem:[%s1321_s27 + $0xc8] sm:$0xff]  ;;  %v1556_v43 = vld [vmem:[%s1321_s27 + $0xc0] sm:$0xff] }
  0x40   : > { %v1563_v44 = vld [vmem:[%s1321_s27 + $0xd8] sm:$0xff]  ;;  %v1566_v45 = vld [vmem:[%s1321_s27 + $0xd0] sm:$0xff]  ;;  %v1573_v46 = vld [vmem:[%s1321_s27 + $0xe8] sm:$0xff] }
  0x41   : > { %v1576_v47 = vld [vmem:[%s1321_s27 + $0xe0] sm:$0xff]  ;;  %s1211_s27 = smov 127  }
  0x42   : > { %288 = vperm.xlu1 %1087, %v1378_v9   ;;  %283 = vperm.xlu0 %1086, %v1383_v10   ;;  %2346 = vst [vmem:[#allocation23_spill] sm:$0xff] %v1576_v47 }
  0x46   : > { %298 = vperm.xlu1 %1087, %v1390_v11   ;;  %293 = vperm.xlu0 %1086, %v1395_v12  }
  0x4a   : > { %308 = vperm.xlu1 %1087, %v1402_v13   ;;  %303 = vperm.xlu0 %1086, %v1407_v14  }
  0x4e   : > { %1088 = vset.pattern.permute.xlu1 %v1208_v16  ;;  %313 = vperm.xlu0 %1086, %v1414_v15  }
  0x4f   : > { %347 = vperm.xlu1 %1088, %v1335_v2  }
  0x52   : > { %1089 = vset.pattern.permute.xlu0 %v1208_v16 }
  0x53   : > { %355 = vperm.xlu1 %1088, %v1330_v1   ;;  %351 = vperm.xlu0 %1089, %v1347_v4  }
  0x57   : > { %359 = vperm.xlu1 %1088, %v1342_v3   ;;  %363 = vperm.xlu0 %1089, %v1359_v6  }
  0x5b   : > { %367 = vperm.xlu1 %1088, %v1354_v5   ;;  %371 = vperm.xlu0 %1089, %v1371_v8  }
  0x5f   : > { %375 = vperm.xlu1 %1088, %v1366_v7   ;;  %379 = vperm.xlu0 %1089, %v1383_v10  }
  0x63   : > { %383 = vperm.xlu1 %1088, %v1378_v9   ;;  %387 = vperm.xlu0 %1089, %v1395_v12  }
  0x67   : > { %391 = vperm.xlu1 %1088, %v1390_v11   ;;  %395 = vperm.xlu0 %1089, %v1407_v14  }
  0x6b   : > { %399 = vperm.xlu1 %1088, %v1402_v13   ;;  %403 = vperm.xlu0 %1089, %v1414_v15  }
  0x6f   : > { %438 = vrot.lane.b32.xlu0 %v1433_v17, %s1209_s28  ;;  %436 = vrot.lane.b32.xlu1 %v1436_v18, %s1209_s28 }
  0x70   : > { %1090 = vset.pattern.permute.xlu1 %v1210_v21  ;;  %1091 = vset.pattern.permute.xlu0 %v1210_v21 }
  0x73   : > { %442 = vrot.lane.b32.xlu0 %v1443_v19, %s1209_s28  ;;  %440 = vrot.lane.b32.xlu1 %v1446_v20, %s1209_s28 }
  0x77   : > { %446 = vrot.lane.b32.xlu0 %v1453_v22, %s1209_s28  ;;  %444 = vrot.lane.b32.xlu1 %v1456_v23, %s1209_s28 }
  0x7b   : > { %450 = vrot.lane.b32.xlu0 %v1463_v24, %s1209_s28  ;;  %448 = vrot.lane.b32.xlu1 %v1466_v25, %s1209_s28 }
  0x7f   : > { %454 = vrot.lane.b32.xlu0 %v1473_v26, %s1209_s28  ;;  %452 = vrot.lane.b32.xlu1 %v1476_v27, %s1209_s28 }
  0x83   : > { %458 = vrot.lane.b32.xlu0 %v1483_v28, %s1209_s28  ;;  %456 = vrot.lane.b32.xlu1 %v1486_v29, %s1209_s28 }
  0x87   : > { %462 = vrot.lane.b32.xlu0 %v1493_v30, %s1209_s28  ;;  %460 = vrot.lane.b32.xlu1 %v1496_v31, %s1209_s28 }
  0x8b   : > { %466 = vrot.lane.b32.xlu0 %v1503_v32, %s1209_s28  ;;  %464 = vrot.lane.b32.xlu1 %v1506_v33, %s1209_s28 }
  0x8f   : > { %470 = vrot.lane.b32.xlu0 %v1513_v34, %s1209_s28  ;;  %468 = vrot.lane.b32.xlu1 %v1516_v35, %s1209_s28 }
  0x93   : > { %474 = vrot.lane.b32.xlu0 %v1523_v36, %s1209_s28  ;;  %472 = vrot.lane.b32.xlu1 %v1526_v37, %s1209_s28 }
  0x97   : > { %478 = vrot.lane.b32.xlu0 %v1533_v38, %s1209_s28  ;;  %476 = vrot.lane.b32.xlu1 %v1536_v39, %s1209_s28 }
  0x9b   : > { %482 = vrot.lane.b32.xlu0 %v1543_v40, %s1209_s28  ;;  %480 = vrot.lane.b32.xlu1 %v1546_v41, %s1209_s28 }
  0x9f   : > { %486 = vrot.lane.b32.xlu0 %v1553_v42, %s1209_s28  ;;  %484 = vrot.lane.b32.xlu1 %v1556_v43, %s1209_s28 }
  0xa3   : > { %490 = vrot.lane.b32.xlu0 %v1563_v44, %s1209_s28  ;;  %488 = vrot.lane.b32.xlu1 %v1566_v45, %s1209_s28 }
  0xa7   : > { %494 = vrot.lane.b32.xlu0 %v1573_v46, %s1209_s28  ;;  %492 = vrot.lane.b32.xlu1 %v1576_v47, %s1209_s28 }
  0xab   : > { %536 = vperm.xlu0 %1091, %v1347_v4   ;;  %532 = vperm.xlu1 %1090, %v1335_v2  }
  0xad   : > { %v1584_v48 = vpop.permute.xlu1 %253  ;;  %v1586_v49 = vpop.permute.xlu0 %243 }
  0xae   : > { %2347 = vst [vmem:[#allocation24_spill] sm:$0xff] %v1584_v48  ;;  %2348 = vst [vmem:[#allocation25_spill] sm:$0xff] %v1586_v49 }
  0xaf   : > { %548 = vperm.xlu0 %1091, %v1359_v6   ;;  %540 = vperm.xlu1 %1090, %v1330_v1  }
  0xb1   : > { %v1590_v50 = vpop.permute.xlu1 %258  ;;  %v1592_v51 = vpop.permute.xlu0 %248 }
  0xb2   : > { %2349 = vst [vmem:[#allocation26_spill] sm:$0xff] %v1590_v50  ;;  %2350 = vst [vmem:[#allocation27_spill] sm:$0xff] %v1592_v51 }
  0xb3   : > { %556 = vperm.xlu0 %1091, %v1371_v8   ;;  %544 = vperm.xlu1 %1090, %v1342_v3  }
  0xb5   : > { %v1596_v52 = vpop.permute.xlu1 %268  ;;  %v1598_v53 = vpop.permute.xlu0 %263 }
  0xb6   : > { %2351 = vst [vmem:[#allocation28_spill] sm:$0xff] %v1596_v52  ;;  %2352 = vst [vmem:[#allocation29_spill] sm:$0xff] %v1598_v53 }
  0xb7   : > { %564 = vperm.xlu0 %1091, %v1383_v10   ;;  %552 = vperm.xlu1 %1090, %v1354_v5  }
  0xb9   : > { %v1602_v54 = vpop.permute.xlu1 %278  ;;  %v1604_v55 = vpop.permute.xlu0 %273 }
  0xba   : > { %2353 = vst [vmem:[#allocation30_spill] sm:$0xff] %v1602_v54 }
  0xbb   : > { %572 = vperm.xlu0 %1091, %v1395_v12   ;;  %560 = vperm.xlu1 %1090, %v1366_v7  }
  0xbd   : > { %v1608_v56 = vpop.permute.xlu1 %288  ;;  %v1610_v57 = vpop.permute.xlu0 %283 }
  0xbf   : > { %580 = vperm.xlu0 %1091, %v1407_v14   ;;  %568 = vperm.xlu1 %1090, %v1378_v9  }
  0xc1   : > { %v1614_v58 = vpop.permute.xlu1 %298  ;;  %v1616_v59 = vpop.permute.xlu0 %293 }
  0xc3   : > { %588 = vperm.xlu0 %1091, %v1414_v15   ;;  %576 = vperm.xlu1 %1090, %v1390_v11  }
  0xc5   : > { %v1620_v60 = vpop.permute.xlu1 %308  ;;  %v1622_v61 = vpop.permute.xlu0 %303 }
  0xc6   : > { %2354 = vst [vmem:[#allocation31_spill] sm:$0xff] %v1620_v60 }
  0xc7   : > { %653 = vrot.lane.b32.xlu0 %v1433_v17, %s1211_s27  ;;  %584 = vperm.xlu1 %1090, %v1402_v13  }
  0xc8   : > { %1093 = vset.pattern.permute.xlu0 %v1212_v62 }
  0xc9   : > { %v1627_v63 = vpop.permute.xlu0 %313 }
  0xca   : > { %v1629_v0 = vpop.permute.xlu1 %347 }
  0xcb   : > { %2355 = vst [vmem:[#allocation32_spill] sm:$0xff] %v1629_v0  ;;  %657 = vrot.lane.b32.xlu0 %v1443_v19, %s1211_s27  ;;  %651 = vrot.lane.b32.xlu1 %v1436_v18, %s1211_s27 }
  0xcc   : > { %1092 = vset.pattern.permute.xlu1 %v1212_v62 }
  0xce   : > { %v1635_v16 = vpop.permute.xlu1 %355  ;;  %v1637_v21 = vpop.permute.xlu0 %351 }
  0xcf   : > { %2356 = vst [vmem:[#allocation33_spill] sm:$0xff] %v1635_v16  ;;  %2357 = vst [vmem:[#allocation34_spill] sm:$0xff] %v1637_v21  ;;  %661 = vrot.lane.b32.xlu0 %v1453_v22, %s1211_s27  ;;  %655 = vrot.lane.b32.xlu1 %v1446_v20, %s1211_s27 }
  0xd2   : > { %v1643_v54 = vpop.permute.xlu1 %359  ;;  %v1645_v0 = vpop.permute.xlu0 %363 }
  0xd3   : > { %2358 = vst [vmem:[#allocation35_spill] sm:$0xff] %v1643_v54  ;;  %2359 = vst [vmem:[#allocation36_spill] sm:$0xff] %v1645_v0  ;;  %665 = vrot.lane.b32.xlu0 %v1463_v24, %s1211_s27  ;;  %659 = vrot.lane.b32.xlu1 %v1456_v23, %s1211_s27 }
  0xd6   : > { %v1651_v62 = vpop.permute.xlu1 %367  ;;  %v1653_v16 = vpop.permute.xlu0 %371 }
  0xd7   : > { %2360 = vst [vmem:[#allocation37_spill] sm:$0xff] %v1651_v62  ;;  %669 = vrot.lane.b32.xlu0 %v1473_v26, %s1211_s27  ;;  %663 = vrot.lane.b32.xlu1 %v1466_v25, %s1211_s27 }
  0xda   : > { %v1659_v53 = vpop.permute.xlu1 %375  ;;  %v1661_v54 = vpop.permute.xlu0 %379 }
  0xdb   : > { %2361 = vst [vmem:[#allocation38_spill] sm:$0xff] %v1659_v53  ;;  %673 = vrot.lane.b32.xlu0 %v1483_v28, %s1211_s27  ;;  %667 = vrot.lane.b32.xlu1 %v1476_v27, %s1211_s27 }
  0xde   : > { %v1667_v0 = vpop.permute.xlu1 %383  ;;  %v1669_v62 = vpop.permute.xlu0 %387 }
  0xdf   : > { %677 = vrot.lane.b32.xlu0 %v1493_v30, %s1211_s27  ;;  %671 = vrot.lane.b32.xlu1 %v1486_v29, %s1211_s27 }
  0xe2   : > { %v1675_v24 = vpop.permute.xlu1 %391  ;;  %v1677_v53 = vpop.permute.xlu0 %395 }
  0xe3   : > { %681 = vrot.lane.b32.xlu0 %v1503_v32, %s1211_s27  ;;  %675 = vrot.lane.b32.xlu1 %v1496_v31, %s1211_s27 }
  0xe6   : > { %v1683_v23 = vpop.permute.xlu1 %399  ;;  %v1685_v21 = vpop.permute.xlu0 %403 }
  0xe7   : > { %2362 = vst [vmem:[#allocation39_spill] sm:$0xff] %v1683_v23  ;;  %685 = vrot.lane.b32.xlu0 %v1513_v34, %s1211_s27  ;;  %679 = vrot.lane.b32.xlu1 %v1506_v33, %s1211_s27 }
  0xea   : > { %v1691_v52 = vpop.permute.xlu0 %438  ;;  %v1693_v22 = vpop.permute.xlu1 %436 }
  0xeb   : > { %689 = vrot.lane.b32.xlu0 %v1523_v36, %s1211_s27  ;;  %683 = vrot.lane.b32.xlu1 %v1516_v35, %s1211_s27 }
  0xee   : > { %v1699_v50 = vpop.permute.xlu0 %442  ;;  %v1701_v19 = vpop.permute.xlu1 %440 }
  0xef   : > { %693 = vrot.lane.b32.xlu0 %v1533_v38, %s1211_s27  ;;  %687 = vrot.lane.b32.xlu1 %v1526_v37, %s1211_s27 }
  0xf2   : > { %v1707_v32 = vpop.permute.xlu0 %446  ;;  %v1709_v49 = vpop.permute.xlu1 %444 }
  0xf3   : > { %697 = vrot.lane.b32.xlu0 %v1543_v40, %s1211_s27  ;;  %691 = vrot.lane.b32.xlu1 %v1536_v39, %s1211_s27 }
  0xf6   : > { %v1715_v36 = vpop.permute.xlu0 %450  ;;  %v1717_v18 = vpop.permute.xlu1 %448 }
  0xf7   : > { %701 = vrot.lane.b32.xlu0 %v1553_v42, %s1211_s27  ;;  %695 = vrot.lane.b32.xlu1 %v1546_v41, %s1211_s27 }
  0xfa   : > { %v1723_v37 = vpop.permute.xlu0 %454  ;;  %v1725_v35 = vpop.permute.xlu1 %452 }
  0xfb   : > { %751 = vperm.xlu0 %1093, %v1347_v4   ;;  %699 = vrot.lane.b32.xlu1 %v1556_v43, %s1211_s27 }
  0xfe   : > { %v1730_v39 = vpop.permute.xlu0 %458  ;;  %v1732_v51 = vpop.permute.xlu1 %456 }
  0xff   : > { %763 = vperm.xlu0 %1093, %v1359_v6   ;;  %747 = vperm.xlu1 %1092, %v1335_v2  }
 0x102   : > { %v1736_v17 = vpop.permute.xlu0 %462  ;;  %v1738_v41 = vpop.permute.xlu1 %460 }
 0x103   : > { %2363 = vst [vmem:[#allocation40_spill] sm:$0xff] %v1736_v17  ;;  %771 = vperm.xlu0 %1093, %v1371_v8   ;;  %755 = vperm.xlu1 %1092, %v1330_v1  }
 0x106   : > { %v467_v4 = vpop.permute.xlu0 %466  ;;  %v1742_v34 = vpop.permute.xlu1 %464 }
 0x107   : > { %2364 = vst [vmem:[#allocation41_spill] sm:$0xff] %v1742_v34  ;;  %779 = vperm.xlu0 %1093, %v1383_v10   ;;  %759 = vperm.xlu1 %1092, %v1342_v3  }
 0x10a   : > { %v471_v48 = vpop.permute.xlu0 %470  ;;  %v469_v20 = vpop.permute.xlu1 %468 }
 0x10b   : > { %787 = vperm.xlu0 %1093, %v1395_v12   ;;  %767 = vperm.xlu1 %1092, %v1354_v5   ;;  %v212_v12 = vlaneseq }
 0x10e   : > { %v475_v2 = vpop.permute.xlu0 %474  ;;  %v473_v6 = vpop.permute.xlu1 %472 }
 0x10f   : > { %795 = vperm.xlu0 %1093, %v1407_v14   ;;  %775 = vperm.xlu1 %1092, %v1366_v7   ;;  %v1765_v14 = vand.u32 127, %v212_v12 }
 0x111   : > { %2365 = vst [vmem:[#allocation42_spill] sm:$0xff] %v1765_v14  ;;  %v2322_v23 = vand.u32 15, %v1765_v14 }
 0x112   : > { %v479_v1 = vpop.permute.xlu0 %478  ;;  %v1750_v8 = vpop.permute.xlu1 %476 }
 0x113   : > { %803 = vperm.xlu0 %1093, %v1414_v15   ;;  %783 = vperm.xlu1 %1092, %v1378_v9   ;;  %vm1783_vm0 = vcmp.ge.s32.totalorder %v2322_v23, 1 }
 0x114   : > { %v501_v60 = vsel %vm1783_vm0, %v1693_v22, 0.0  ;;  %v517_v23 = vsel %vm1783_vm0, %v469_v20, 0.0  ;;  %v337_v22 = vmul.f32 %v1604_v55, %v1533_v38  ;;  %v503_v20 = vsel %vm1783_vm0, %v1701_v19, 0.0 }
 0x115   : > { %v324_v19 = vmul.f32 %v1610_v57, %v1476_v27  ;;  %v522_v27 = vsel %vm1783_vm0, %v479_v1, 0.0  ;;  %v341_v1 = vmul.f32 %v1616_v59, %v1553_v42 }
 0x116   : > { %v1754_v3 = vpop.permute.xlu0 %482  ;;  %v1756_v10 = vpop.permute.xlu1 %480 }
 0x117   : > { %705 = vrot.lane.b32.xlu0 %v1563_v44, %s1211_s27  ;;  %791 = vperm.xlu1 %1092, %v1390_v11   ;;  %v524_v42 = vsel %vm1783_vm0, %v1754_v3, 0.0  ;;  %v343_v3 = vmul.f32 %v1622_v61, %v1563_v44 }
 0x11a   : > { %v1761_v5 = vpop.permute.xlu0 %486  ;;  %v1763_v7 = vpop.permute.xlu1 %484 }
 0x11b   : > { %709 = vrot.lane.b32.xlu0 %v1573_v46, %s1211_s27  ;;  %799 = vperm.xlu1 %1092, %v1402_v13   ;;  %v502_v13 = vsel %vm1783_vm0, %v1691_v52, 0.0  ;;  %v322_v52 = vmul.f32 %v1604_v55, %v1466_v25  ;;  %v526_v44 = vsel %vm1783_vm0, %v1761_v5, 0.0 }
 0x11e   : > { %v1770_v9 = vpop.permute.xlu0 %490  ;;  %v1772_v15 = vpop.permute.xlu1 %488 }
 0x11f   : > { %2366 = vst [vmem:[#allocation43_spill] sm:$0xff] %v1772_v15  ;;  %703 = vrot.lane.b32.xlu1 %v1566_v45, %s1211_s27 }
 0x122   : > { %v1777_v11 = vpop.permute.xlu0 %494  ;;  %v1779_v17 = vpop.permute.xlu1 %492 }
 0x123   : > { %2367 = vst [vmem:[#allocation44_spill] sm:$0xff] %v1777_v11  ;;  %2368 = vst [vmem:[#allocation45_spill] sm:$0xff] %v1779_v17  ;;  %707 = vrot.lane.b32.xlu1 %v1576_v47, %s1211_s27  ;;  %v516_v17 = vsel %vm1783_vm0, %v467_v4, 0.0  ;;  %v505_v4 = vsel %vm1783_vm0, %v1709_v49, 0.0  ;;  %v339_v49 = vmul.f32 %v1610_v57, %v1543_v40 }
 0x126   : > { %v537_v14 = vpop.permute.xlu0 %536  ;;  %v533_v30 = vpop.permute.xlu1 %532 }
 0x127   : > { %v1799_v11 = vmul.f32 %v537_v14, %v502_v13  ;;  %v1801_v15 = vmul.f32 %v537_v14, %v517_v23  ;;  %v1803_v47 = vmul.f32 %v533_v30, %v501_v60  ;;  %v1805_v34 = vmul.f32 %v533_v30, %v516_v17 }
 0x128   : > { %v518_v23 = vsel %vm1783_vm0, %v471_v48, 0.0  ;;  %v520_v17 = vsel %vm1783_vm0, %v475_v2, 0.0  ;;  %v412_v48 = vadd.f32 %v1653_v16, %v322_v52  ;;  %v427_v2 = vadd.f32 %v1653_v16, %v337_v22 }
 0x129   : > { %v504_v13 = vsel %vm1783_vm0, %v1699_v50, 0.0  ;;  %v325_v50 = vmul.f32 %v1608_v56, %v1473_v26  ;;  %v414_v22 = vadd.f32 %v1661_v54, %v324_v19  ;;  %v506_v26 = vsel %vm1783_vm0, %v1707_v32, 0.0 }
 0x12a   : > { %v549_v30 = vpop.permute.xlu0 %548  ;;  %v541_v60 = vpop.permute.xlu1 %540  ;;  %v327_v32 = vmul.f32 %v1614_v58, %v1483_v28  ;;  %v508_v28 = vsel %vm1783_vm0, %v1715_v36, 0.0  ;;  %v330_v36 = vmul.f32 %v1627_v63, %v1506_v33  ;;  %v513_v33 = vsel %vm1783_vm0, %v1738_v41, 0.0 }
 0x12b   : > { %v1821_v25 = vmul.f32 %v549_v30, %v505_v4  ;;  %v1823_v14 = vmul.f32 %v549_v30, %v520_v17  ;;  %v1825_v38 = vmul.f32 %v541_v60, %v503_v20  ;;  %v1827_v55 = vmul.f32 %v541_v60, %v518_v23 }
 0x12c   : > { %v507_v20 = vsel %vm1783_vm0, %v1717_v18, 0.0  ;;  %v519_v4 = vsel %vm1783_vm0, %v473_v6, 0.0  ;;  %v340_v18 = vmul.f32 %v1608_v56, %v1556_v43  ;;  %v326_v6 = vmul.f32 %v1616_v59, %v1486_v29 }
 0x12d   : > { %v429_v30 = vadd.f32 %v1661_v54, %v339_v49  ;;  %v509_v43 = vsel %vm1783_vm0, %v1725_v35, 0.0  ;;  %v521_v29 = vsel %vm1783_vm0, %v1750_v8, 0.0  ;;  %v342_v35 = vmul.f32 %v1614_v58, %v1566_v45 }
 0x12e   : > { %v557_v23 = vpop.permute.xlu0 %556  ;;  %v545_v40 = vpop.permute.xlu1 %544  ;;  %v328_v8 = vmul.f32 %v1622_v61, %v1496_v31  ;;  %v511_v45 = vsel %vm1783_vm0, %v1732_v51, 0.0  ;;  %v523_v31 = vsel %vm1783_vm0, %v1756_v10, 0.0  ;;  %v345_v51 = vmul.f32 %v1627_v63, %v1573_v46 }
 0x12f   : > { %v597_v57 = vmul.f32 %v557_v23, %v507_v20  ;;  %v612_v52 = vmul.f32 %v557_v23, %v522_v27  ;;  %v1845_v17 = vmul.f32 %v545_v40, %v504_v13  ;;  %v1847_v16 = vmul.f32 %v545_v40, %v519_v4 }
 0x130   : > { %v431_v20 = vadd.f32 %v1669_v62, %v341_v1  ;;  %v415_v10 = vadd.f32 %v1667_v0, %v325_v50  ;;  %v418_v5 = vadd.f32 %v1677_v53, %v328_v8  ;;  %v525_v46 = vsel %vm1783_vm0, %v1763_v7, 0.0 }
 0x131   : > { %v1859_v60 = vadd.f32 %v597_v57, %v412_v48  ;;  %v1861_v13 = vadd.f32 %v612_v52, %v427_v2  ;;  %v416_v2 = vadd.f32 %v1669_v62, %v326_v6  ;;  %v430_v52 = vadd.f32 %v1667_v0, %v340_v18 }
 0x132   : > { %v565_v54 = vpop.permute.xlu0 %564  ;;  %v553_v56 = vpop.permute.xlu1 %552  ;;  %v433_v6 = vadd.f32 %v1677_v53, %v343_v3  ;;  %v528_v53 = vsel %vm1783_vm0, %v1770_v9, 0.0  ;;  %v420_v41 = vadd.f32 %v1685_v21, %v330_v36 }
 0x133   : > { %v599_v59 = vmul.f32 %v565_v54, %v509_v43  ;;  %v614_v19 = vmul.f32 %v565_v54, %v524_v42  ;;  %v1875_v49 = vmul.f32 %v553_v56, %v506_v26  ;;  %v1877_v48 = vmul.f32 %v553_v56, %v521_v29 }
 0x134   : > { %v432_v29 = vadd.f32 %v1675_v24, %v342_v35  ;;  %v435_v42 = vadd.f32 %v1685_v21, %v345_v51  ;;  %v2379_v35 = vld [vmem:[#allocation44_spill] sm:$0xff] }
 0x135   : > { %v1889_v4 = vadd.f32 %v599_v59, %v414_v22  ;;  %v1891_v27 = vadd.f32 %v614_v19, %v429_v30  ;;  %v510_v30 = vsel %vm1783_vm0, %v1723_v37, 0.0  ;;  %v417_v37 = vadd.f32 %v1675_v24, %v327_v32  ;;  %v2377_v19 = vld [vmem:[#allocation41_spill] sm:$0xff]  ;;  %v2378_v32 = vld [vmem:[#allocation43_spill] sm:$0xff] }
 0x136   : > { %v573_v58 = vpop.permute.xlu0 %572  ;;  %v561_v61 = vpop.permute.xlu1 %560  ;;  %v512_v59 = vsel %vm1783_vm0, %v1730_v39, 0.0  ;;  %v515_v24 = vsel %vm1783_vm0, %v2377_v19, 0.0  ;;  %v527_v21 = vsel %vm1783_vm0, %v2378_v32, 0.0  ;;  %v530_v8 = vsel %vm1783_vm0, %v2379_v35, 0.0  ;;  %v2381_v39 = vld [vmem:[#allocation31_spill] sm:$0xff] }
 0x137   : > { %v601_v62 = vmul.f32 %v573_v58, %v511_v45  ;;  %v616_v23 = vmul.f32 %v573_v58, %v526_v44  ;;  %v1905_v40 = vmul.f32 %v561_v61, %v508_v28  ;;  %v1907_v57 = vmul.f32 %v561_v61, %v523_v31  ;;  %v2380_v44 = vld [vmem:[#allocation15_spill] sm:$0xff] }
 0x138   : > { %v329_v58 = vmul.f32 %v2381_v39, %v2380_v44  ;;  %v2382_v61 = vld [vmem:[#allocation23_spill] sm:$0xff] }
 0x139   : > { %2371 = vst [vmem:[#allocation46_spill] sm:$0xff] %v1905_v40  ;;  %2372 = vst [vmem:[#allocation47_spill] sm:$0xff] %v1907_v57  ;;  %v1917_v1 = vadd.f32 %v601_v62, %v416_v2  ;;  %v1919_v22 = vadd.f32 %v616_v23, %v431_v20  ;;  %v344_v62 = vmul.f32 %v2381_v39, %v2382_v61 }
 0x13a   : > { %v581_v63 = vpop.permute.xlu0 %580  ;;  %v569_v0 = vpop.permute.xlu1 %568 }
 0x13b   : > { %v603_v50 = vmul.f32 %v581_v63, %v513_v33  ;;  %v618_v18 = vmul.f32 %v581_v63, %v528_v53  ;;  %v600_v26 = vmul.f32 %v569_v0, %v510_v30  ;;  %v615_v43 = vmul.f32 %v569_v0, %v525_v46  ;;  %v2389_v53 = vld [vmem:[#allocation39_spill] sm:$0xff] }
 0x13c   : > { %v419_v63 = vadd.f32 %v2389_v53, %v329_v58  ;;  %v434_v0 = vadd.f32 %v2389_v53, %v344_v62  ;;  %v2398_v62 = vld [vmem:[#allocation11_spill] sm:$0xff] }
 0x13d   : > { %v1937_v54 = vadd.f32 %v603_v50, %v418_v5  ;;  %v1939_v7 = vadd.f32 %v618_v18, %v433_v6  ;;  %v1941_v56 = vadd.f32 %v600_v26, %v415_v10  ;;  %v1943_v9 = vadd.f32 %v615_v43, %v430_v52  ;;  %v2387_v52 = vld [vmem:[#allocation40_spill] sm:$0xff]  ;;  %v2388_v6 = vld [vmem:[#allocation45_spill] sm:$0xff] }
 0x13e   : > { %v589_v3 = vpop.permute.xlu0 %588  ;;  %v577_v2 = vpop.permute.xlu1 %576  ;;  %v514_v5 = vsel %vm1783_vm0, %v2387_v52, 0.0  ;;  %v529_v30 = vsel %vm1783_vm0, %v2388_v6, 0.0  ;;  %v2399_v52 = vld [vmem:[#allocation24_spill] sm:$0xff] }
 0x13f   : > { %2373 = vst [vmem:[#allocation48_spill] sm:$0xff] %v1937_v54  ;;  %2374 = vst [vmem:[#allocation49_spill] sm:$0xff] %v1939_v7  ;;  %v605_v20 = vmul.f32 %v589_v3, %v515_v24  ;;  %v620_v28 = vmul.f32 %v589_v3, %v530_v8  ;;  %v602_v45 = vmul.f32 %v577_v2, %v512_v59  ;;  %v2411_v7 = vld [vmem:[#allocation16_spill] sm:$0xff]  ;;  %v2421_v54 = vld [vmem:[#allocation19_spill] sm:$0xff] }
 0x140   : > { %2375 = vst [vmem:[#allocation50_spill] sm:$0xff] %v1941_v56  ;;  %2376 = vst [vmem:[#allocation51_spill] sm:$0xff] %v1943_v9  ;;  %v617_v31 = vmul.f32 %v577_v2, %v527_v21  ;;  %v2412_v9 = vld [vmem:[#allocation10_spill] sm:$0xff] }
 0x141   : > { %v1961_v23 = vadd.f32 %v605_v20, %v420_v41  ;;  %v1963_v36 = vadd.f32 %v620_v28, %v435_v42  ;;  %v1965_v51 = vadd.f32 %v602_v45, %v417_v37 }
 0x142   : > { %v1967_v10 = vadd.f32 %v617_v31, %v432_v29  ;;  %v654_v33 = vpop.permute.xlu0 %653  ;;  %v585_v46 = vpop.permute.xlu1 %584 }
 0x143   : > { %2383 = vst [vmem:[#allocation41_spill] sm:$0xff] %v1961_v23  ;;  %2384 = vst [vmem:[#allocation43_spill] sm:$0xff] %v1963_v36  ;;  %v604_v50 = vmul.f32 %v585_v46, %v514_v5  ;;  %v619_v18 = vmul.f32 %v585_v46, %v529_v30  ;;  %v318_v5 = vmul.f32 %v2399_v52, %v2398_v62  ;;  %v2401_v46 = vld [vmem:[#allocation17_spill] sm:$0xff] }
 0x144   : > { %2385 = vst [vmem:[#allocation44_spill] sm:$0xff] %v1965_v51  ;;  %2386 = vst [vmem:[#allocation15_spill] sm:$0xff] %v1967_v10  ;;  %v333_v53 = vmul.f32 %v2399_v52, %v2401_v46  ;;  %v2405_v10 = vld [vmem:[#allocation42_spill] sm:$0xff]  ;;  %v2409_v62 = vld [vmem:[#allocation9_spill] sm:$0xff] }
 0x145   : > { %v1977_v26 = vadd.f32 %v604_v50, %v419_v63  ;;  %v1979_v43 = vadd.f32 %v619_v18, %v434_v0  ;;  %v2402_v63 = vld [vmem:[#allocation8_spill] sm:$0xff]  ;;  %v2403_v0 = vld [vmem:[#allocation27_spill] sm:$0xff]  ;;  %v2404_v18 = vld [vmem:[#allocation18_spill] sm:$0xff] }
 0x146   : > { %v1981_v37 = vpop.permute.xlu0 %657  ;;  %v1983_v29 = vpop.permute.xlu1 %651  ;;  %v317_v50 = vmul.f32 %v2403_v0, %v2402_v63  ;;  %v2413_v52 = vld [vmem:[#allocation26_spill] sm:$0xff]  ;;  %v2414_v63 = vld [vmem:[#allocation20_spill] sm:$0xff] }
 0x147   : > { %2390 = vst [vmem:[#allocation31_spill] sm:$0xff] %v1977_v26  ;;  %2391 = vst [vmem:[#allocation23_spill] sm:$0xff] %v1979_v43  ;;  %v332_v43 = vmul.f32 %v2403_v0, %v2404_v18  ;;  %v2406_v26 = vand.u32 15, %v2405_v10  ;;  %v2041_v46 = vmul.f32 %v2413_v52, %v2412_v9  ;;  %v2045_v56 = vmul.f32 %v2413_v52, %v2414_v63  ;;  %v2415_v0 = vld [vmem:[#allocation12_spill] sm:$0xff]  ;;  %v2417_v18 = vld [vmem:[#allocation21_spill] sm:$0xff] }
 0x148   : > { %v2416_v10 = vld [vmem:[#allocation28_spill] sm:$0xff] }
 0x149   : > { %vm2031_vm1 = vcmp.lt.s32.totalorder %v2406_v26, 15  ;;  %v2049_v26 = vmul.f32 %v2416_v10, %v2415_v0  ;;  %v2053_v23 = vmul.f32 %v2416_v10, %v2417_v18 }
 0x14a   : > { %v1985_v41 = vpop.permute.xlu0 %661  ;;  %v1987_v12 = vpop.permute.xlu1 %655  ;;  %v717_v52 = vsel %vm2031_vm1, %v654_v33, 0.0 }
 0x14e   : > { %v1989_v42 = vpop.permute.xlu0 %665  ;;  %v660_v59 = vpop.permute.xlu1 %659 }
 0x14f   : > { %2392 = vst [vmem:[#allocation40_spill] sm:$0xff] %v1989_v42 }
 0x152   : > { %v1991_v19 = vpop.permute.xlu0 %669  ;;  %v1993_v24 = vpop.permute.xlu1 %663 }
 0x153   : > { %2393 = vst [vmem:[#allocation45_spill] sm:$0xff] %v1991_v19 }
 0x156   : > { %v1995_v32 = vpop.permute.xlu0 %673  ;;  %v1997_v21 = vpop.permute.xlu1 %667 }
 0x157   : > { %2394 = vst [vmem:[#allocation39_spill] sm:$0xff] %v1995_v32 }
 0x15a   : > { %v1999_v35 = vpop.permute.xlu0 %677  ;;  %v2001_v8 = vpop.permute.xlu1 %671 }
 0x15b   : > { %2395 = vst [vmem:[#allocation52_spill] sm:$0xff] %v1999_v35  ;;  %v2410_v35 = vld [vmem:[#allocation25_spill] sm:$0xff] }
 0x15c   : > { %v316_v51 = vmul.f32 %v2410_v35, %v2409_v62  ;;  %v331_v32 = vmul.f32 %v2410_v35, %v2411_v7  ;;  %v2418_v62 = vld [vmem:[#allocation34_spill] sm:$0xff]  ;;  %v2419_v35 = vld [vmem:[#allocation13_spill] sm:$0xff] }
 0x15d   : > { %v407_v19 = vadd.f32 %v2418_v62, %v317_v50  ;;  %v422_v7 = vadd.f32 %v2418_v62, %v332_v43  ;;  %v2423_v62 = vld [vmem:[#allocation14_spill] sm:$0xff] }
 0x15e   : > { %v682_v3 = vpop.permute.xlu0 %681  ;;  %v2003_v2 = vpop.permute.xlu1 %675 }
 0x15f   : > { %2396 = vst [vmem:[#allocation53_spill] sm:$0xff] %v2003_v2  ;;  %v622_v10 = vadd.f32 %v1799_v11, %v407_v19  ;;  %v637_v50 = vadd.f32 %v1801_v15, %v422_v7 }
 0x162   : > { %v2005_v20 = vpop.permute.xlu0 %685  ;;  %v2007_v28 = vpop.permute.xlu1 %679 }
 0x163   : > { %2397 = vst [vmem:[#allocation54_spill] sm:$0xff] %v2007_v28  ;;  %v2420_v28 = vld [vmem:[#allocation29_spill] sm:$0xff] }
 0x164   : > { %v320_v9 = vmul.f32 %v2420_v28, %v2419_v35  ;;  %v335_v57 = vmul.f32 %v2420_v28, %v2421_v54  ;;  %v2424_v35 = vld [vmem:[#allocation30_spill] sm:$0xff]  ;;  %v2426_v28 = vld [vmem:[#allocation36_spill] sm:$0xff] }
 0x165   : > { %v2425_v54 = vld [vmem:[#allocation22_spill] sm:$0xff] }
 0x166   : > { %v690_v45 = vpop.permute.xlu0 %689  ;;  %v684_v31 = vpop.permute.xlu1 %683  ;;  %v2075_v33 = vmul.f32 %v2424_v35, %v2425_v54  ;;  %v425_v42 = vadd.f32 %v2426_v28, %v335_v57  ;;  %v716_v57 = vsel %vm2031_vm1, %v1983_v29, 0.0 }
 0x167   : > { %v732_v63 = vsel %vm2031_vm1, %v684_v31, 0.0  ;;  %v410_v31 = vadd.f32 %v2426_v28, %v320_v9 }
 0x169   : > { %v625_v7 = vadd.f32 %v1821_v25, %v410_v31 }
 0x16a   : > { %v2009_v44 = vpop.permute.xlu0 %693  ;;  %v2011_v39 = vpop.permute.xlu1 %687 }
 0x16e   : > { %v2013_v58 = vpop.permute.xlu0 %697  ;;  %v2015_v61 = vpop.permute.xlu1 %691 }
 0x172   : > { %v2019_v6 = vpop.permute.xlu0 %701  ;;  %v2021_v30 = vpop.permute.xlu1 %695 }
 0x173   : > { %2400 = vst [vmem:[#allocation11_spill] sm:$0xff] %v2021_v30  ;;  %v2071_v30 = vmul.f32 %v2424_v35, %v2423_v62 }
 0x176   : > { %v752_v0 = vpop.permute.xlu0 %751  ;;  %v2065_v40 = vpop.permute.xlu1 %699 }
 0x177   : > { %2422 = vst [vmem:[#allocation24_spill] sm:$0xff] %v2065_v40  ;;  %v807_v43 = vmul.f32 %v752_v0, %v717_v52  ;;  %v822_v18 = vmul.f32 %v752_v0, %v732_v63  ;;  %v2427_v40 = vld [vmem:[#allocation32_spill] sm:$0xff]  ;;  %v640_v52 = vadd.f32 %v1823_v14, %v425_v42  ;;  %v720_v63 = vsel %vm2031_vm1, %v660_v59, 0.0 }
 0x178   : > { %v406_v2 = vadd.f32 %v2427_v40, %v316_v51  ;;  %v421_v11 = vadd.f32 %v2427_v40, %v331_v32  ;;  %v735_v0 = vsel %vm2031_vm1, %v690_v45, 0.0  ;;  %v731_v40 = vsel %vm2031_vm1, %v682_v3, 0.0  ;;  %v2428_v45 = vld [vmem:[#allocation33_spill] sm:$0xff] }
 0x179   : > { %v837_v15 = vadd.f32 %v807_v43, %v622_v10  ;;  %v852_v19 = vadd.f32 %v822_v18, %v637_v50  ;;  %v408_v3 = vadd.f32 %v2428_v45, %v318_v5  ;;  %v423_v9 = vadd.f32 %v2428_v45, %v333_v53 }
 0x17a   : > { %v764_v62 = vpop.permute.xlu0 %763  ;;  %v748_v51 = vpop.permute.xlu1 %747  ;;  %v621_v42 = vadd.f32 %v1803_v47, %v406_v2  ;;  %v636_v59 = vadd.f32 %v1805_v34, %v421_v11  ;;  %v722_v43 = vsel %vm2031_vm1, %v1993_v24, 0.0  ;;  %v737_v47 = vsel %vm2031_vm1, %v2009_v44, 0.0 }
 0x17b   : > { %867 = vst [vmem:[%s2094_s29 + $0x8] sm:$0xff] %v837_v15  ;;  %882 = vst [vmem:[%s2094_s29 + $0x80] sm:$0xff] %v852_v19  ;;  %v810_v25 = vmul.f32 %v764_v62, %v720_v63  ;;  %v825_v14 = vmul.f32 %v764_v62, %v735_v0  ;;  %v806_v29 = vmul.f32 %v748_v51, %v716_v57  ;;  %v718_v5 = vsel %vm2031_vm1, %v1987_v12, 0.0  ;;  %v2429_v12 = vld [vmem:[#allocation35_spill] sm:$0xff] }
 0x17c   : > { %v821_v32 = vmul.f32 %v748_v51, %v731_v40  ;;  %v733_v53 = vsel %vm2031_vm1, %v2005_v20, 0.0  ;;  %v623_v28 = vadd.f32 %v1825_v38, %v408_v3  ;;  %v638_v44 = vadd.f32 %v1827_v55, %v423_v9 }
 0x17d   : > { %v840_v10 = vadd.f32 %v810_v25, %v625_v7  ;;  %v855_v50 = vadd.f32 %v825_v14, %v640_v52  ;;  %v836_v2 = vadd.f32 %v806_v29, %v621_v42  ;;  %v409_v15 = vadd.f32 %v2429_v12, %v2041_v46 }
 0x17e   : > { %v851_v34 = vadd.f32 %v821_v32, %v636_v59  ;;  %v772_v18 = vpop.permute.xlu0 %771  ;;  %v756_v24 = vpop.permute.xlu1 %755  ;;  %v424_v20 = vadd.f32 %v2429_v12, %v2045_v56  ;;  %v724_v38 = vsel %vm2031_vm1, %v1997_v21, 0.0  ;;  %v739_v55 = vsel %vm2031_vm1, %v2013_v58, 0.0 }
 0x17f   : > { %870 = vst [vmem:[%s2094_s29 + $0x20] sm:$0xff] %v840_v10  ;;  %885 = vst [vmem:[%s2094_s29 + $0x98] sm:$0xff] %v855_v50  ;;  %v812_v35 = vmul.f32 %v772_v18, %v722_v43  ;;  %v827_v54 = vmul.f32 %v772_v18, %v737_v47  ;;  %v808_v31 = vmul.f32 %v756_v24, %v718_v5  ;;  %v719_v56 = vsel %vm2031_vm1, %v1981_v37, 0.0  ;;  %v2430_v37 = vld [vmem:[#allocation37_spill] sm:$0xff]  ;;  %v2434_v18 = vld [vmem:[#allocation11_spill] sm:$0xff] }
 0x180   : > { %866 = vst [vmem:[%s2094_s29] sm:$0xff] %v836_v2  ;;  %881 = vst [vmem:[%s2094_s29 + $0x78] sm:$0xff] %v851_v34  ;;  %v823_v11 = vmul.f32 %v756_v24, %v733_v53  ;;  %v624_v62 = vadd.f32 %v1845_v17, %v409_v15  ;;  %v639_v58 = vadd.f32 %v1847_v16, %v424_v20  ;;  %v726_v17 = vsel %vm2031_vm1, %v2001_v8, 0.0  ;;  %v2432_v50 = vld [vmem:[#allocation53_spill] sm:$0xff]  ;;  %v2433_v34 = vld [vmem:[#allocation40_spill] sm:$0xff] }
 0x181   : > { %v842_v19 = vadd.f32 %v812_v35, %v1859_v60  ;;  %v857_v7 = vadd.f32 %v827_v54, %v1861_v13  ;;  %v838_v52 = vadd.f32 %v808_v31, %v623_v28  ;;  %v734_v60 = vsel %vm2031_vm1, %v2011_v39, 0.0  ;;  %v2435_v5 = vld [vmem:[#allocation46_spill] sm:$0xff]  ;;  %v2436_v35 = vld [vmem:[#allocation47_spill] sm:$0xff] }
 0x182   : > { %v853_v63 = vadd.f32 %v823_v11, %v638_v44  ;;  %v780_v46 = vpop.permute.xlu0 %779  ;;  %v760_v21 = vpop.permute.xlu1 %759  ;;  %v411_v25 = vadd.f32 %v2430_v37, %v2049_v26  ;;  %v426_v39 = vadd.f32 %v2430_v37, %v2053_v23  ;;  %v741_v16 = vsel %vm2031_vm1, %v2019_v6, 0.0  ;;  %v2437_v44 = vld [vmem:[#allocation48_spill] sm:$0xff]  ;;  %v2438_v11 = vld [vmem:[#allocation54_spill] sm:$0xff]  ;;  %v2444_v37 = vld [vmem:[#allocation39_spill] sm:$0xff] }
 0x183   : > { %872 = vst [vmem:[%s2094_s29 + $0x30] sm:$0xff] %v842_v19  ;;  %887 = vst [vmem:[%s2094_s29 + $0xa8] sm:$0xff] %v857_v7  ;;  %v814_v13 = vmul.f32 %v780_v46, %v724_v38  ;;  %v829_v0 = vmul.f32 %v780_v46, %v739_v55  ;;  %v809_v57 = vmul.f32 %v760_v21, %v719_v56  ;;  %v721_v23 = vsel %vm2031_vm1, %v1985_v41, 0.0  ;;  %v2431_v41 = vld [vmem:[#allocation38_spill] sm:$0xff]  ;;  %v2439_v7 = vld [vmem:[#allocation45_spill] sm:$0xff] }
 0x184   : > { %868 = vst [vmem:[%s2094_s29 + $0x10] sm:$0xff] %v838_v52  ;;  %883 = vst [vmem:[%s2094_s29 + $0x88] sm:$0xff] %v853_v63  ;;  %v824_v40 = vmul.f32 %v760_v21, %v734_v60  ;;  %v626_v32 = vadd.f32 %v1875_v49, %v411_v25  ;;  %v641_v6 = vadd.f32 %v1877_v48, %v426_v39  ;;  %v728_v48 = vsel %vm2031_vm1, %v2432_v50, 0.0  ;;  %v2440_v55 = vld [vmem:[#allocation24_spill] sm:$0xff]  ;;  %v2442_v21 = vld [vmem:[#allocation50_spill] sm:$0xff] }
 0x185   : > { %v844_v14 = vadd.f32 %v814_v13, %v1889_v4  ;;  %v859_v51 = vadd.f32 %v829_v0, %v1891_v27  ;;  %v839_v42 = vadd.f32 %v809_v57, %v624_v62  ;;  %v736_v4 = vsel %vm2031_vm1, %v2015_v61, 0.0  ;;  %v2441_v13 = vld [vmem:[#allocation41_spill] sm:$0xff]  ;;  %v2450_v50 = vld [vmem:[#allocation15_spill] sm:$0xff] }
 0x186   : > { %v854_v59 = vadd.f32 %v824_v40, %v639_v58  ;;  %v788_v26 = vpop.permute.xlu0 %787  ;;  %v768_v8 = vpop.permute.xlu1 %767  ;;  %v413_v9 = vadd.f32 %v2431_v41, %v2071_v30  ;;  %v428_v49 = vadd.f32 %v2431_v41, %v2075_v33  ;;  %v723_v30 = vsel %vm2031_vm1, %v2433_v34, 0.0  ;;  %v2443_v58 = vld [vmem:[#allocation51_spill] sm:$0xff] }
 0x187   : > { %874 = vst [vmem:[%s2094_s29 + $0x40] sm:$0xff] %v844_v14  ;;  %889 = vst [vmem:[%s2094_s29 + $0xb8] sm:$0xff] %v859_v51  ;;  %v816_v27 = vmul.f32 %v788_v26, %v726_v17  ;;  %v831_v29 = vmul.f32 %v788_v26, %v741_v16  ;;  %v811_v45 = vmul.f32 %v768_v8, %v721_v23  ;;  %v730_v12 = vsel %vm2031_vm1, %v2438_v11, 0.0  ;;  %v2445_v16 = vld [vmem:[#allocation49_spill] sm:$0xff]  ;;  %v2449_v41 = vld [vmem:[#allocation31_spill] sm:$0xff] }
 0x188   : > { %869 = vst [vmem:[%s2094_s29 + $0x18] sm:$0xff] %v839_v42  ;;  %884 = vst [vmem:[%s2094_s29 + $0x90] sm:$0xff] %v854_v59  ;;  %v826_v3 = vmul.f32 %v768_v8, %v736_v4  ;;  %v628_v53 = vadd.f32 %v2435_v5, %v413_v9  ;;  %v643_v54 = vadd.f32 %v2436_v35, %v428_v49  ;;  %v725_v38 = vsel %vm2031_vm1, %v2439_v7, 0.0  ;;  %v2446_v59 = vld [vmem:[#allocation44_spill] sm:$0xff]  ;;  %v2451_v34 = vld [vmem:[#allocation23_spill] sm:$0xff] }
 0x189   : > { %v846_v61 = vadd.f32 %v816_v27, %v1917_v1  ;;  %v861_v10 = vadd.f32 %v831_v29, %v1919_v22  ;;  %v841_v43 = vadd.f32 %v811_v45, %v626_v32  ;;  %v738_v1 = vsel %vm2031_vm1, %v2434_v18, 0.0  ;;  %v2447_v4 = vld [vmem:[#allocation52_spill] sm:$0xff]  ;;  %v2448_v45 = vld [vmem:[#allocation43_spill] sm:$0xff] }
 0x18a   : > { %v856_v47 = vadd.f32 %v826_v3, %v641_v6  ;;  %v796_v2 = vpop.permute.xlu0 %795  ;;  %v776_v33 = vpop.permute.xlu1 %775  ;;  %v740_v52 = vsel %vm2031_vm1, %v2440_v55, 0.0  ;;  %v727_v25 = vsel %vm2031_vm1, %v2444_v37, 0.0  ;;  %v729_v27 = vsel %vm2031_vm1, %v2447_v4, 0.0 }
 0x18b   : > { %876 = vst [vmem:[%s2094_s29 + $0x50] sm:$0xff] %v846_v61  ;;  %891 = vst [vmem:[%s2094_s29 + $0xc8] sm:$0xff] %v861_v10  ;;  %v818_v22 = vmul.f32 %v796_v2, %v728_v48  ;;  %v813_v24 = vmul.f32 %v776_v33, %v723_v30  ;;  %v828_v28 = vmul.f32 %v776_v33, %v738_v1 }
 0x18c   : > { %871 = vst [vmem:[%s2094_s29 + $0x28] sm:$0xff] %v841_v43  ;;  %886 = vst [vmem:[%s2094_s29 + $0xa0] sm:$0xff] %v856_v47 }
 0x18d   : > { %v848_v31 = vadd.f32 %v818_v22, %v2437_v44  ;;  %v843_v15 = vadd.f32 %v813_v24, %v628_v53  ;;  %v858_v20 = vadd.f32 %v828_v28, %v643_v54 }
 0x18e   : > { %v804_v19 = vpop.permute.xlu0 %803  ;;  %v784_v46 = vpop.permute.xlu1 %783 }
 0x18f   : > { %878 = vst [vmem:[%s2094_s29 + $0x60] sm:$0xff] %v848_v31  ;;  %v820_v63 = vmul.f32 %v804_v19, %v730_v12  ;;  %873 = vst [vmem:[%s2094_s29 + $0x38] sm:$0xff] %v843_v15  ;;  %v815_v56 = vmul.f32 %v784_v46, %v725_v38  ;;  %v830_v60 = vmul.f32 %v784_v46, %v740_v52 }
 0x190   : > { %888 = vst [vmem:[%s2094_s29 + $0xb0] sm:$0xff] %v858_v20 }
 0x191   : > { %v850_v0 = vadd.f32 %v820_v63, %v2441_v13  ;;  %v845_v62 = vadd.f32 %v815_v56, %v2442_v21  ;;  %v860_v57 = vadd.f32 %v830_v60, %v2443_v58 }
 0x192   : > { %v706_v40 = vpop.permute.xlu0 %705  ;;  %v792_v14 = vpop.permute.xlu1 %791 }
 0x193   : > { %880 = vst [vmem:[%s2094_s29 + $0x70] sm:$0xff] %v850_v0  ;;  %v743_v39 = vsel %vm2031_vm1, %v706_v40, 0.0  ;;  %875 = vst [vmem:[%s2094_s29 + $0x48] sm:$0xff] %v845_v62  ;;  %v817_v17 = vmul.f32 %v792_v14, %v727_v25 }
 0x194   : > { %890 = vst [vmem:[%s2094_s29 + $0xc0] sm:$0xff] %v860_v57  ;;  %v833_v51 = vmul.f32 %v796_v2, %v743_v39 }
 0x195   : > { %v847_v26 = vadd.f32 %v817_v17, %v2446_v59 }
 0x196   : > { %v863_v42 = vadd.f32 %v833_v51, %v2445_v16  ;;  %v710_v23 = vpop.permute.xlu0 %709  ;;  %v800_v8 = vpop.permute.xlu1 %799 }
 0x197   : > { %v745_v29 = vsel %vm2031_vm1, %v710_v23, 0.0  ;;  %877 = vst [vmem:[%s2094_s29 + $0x58] sm:$0xff] %v847_v26  ;;  %v819_v6 = vmul.f32 %v800_v8, %v729_v27 }
 0x198   : > { %893 = vst [vmem:[%s2094_s29 + $0xd8] sm:$0xff] %v863_v42  ;;  %v835_v32 = vmul.f32 %v804_v19, %v745_v29 }
 0x199   : > { %v849_v9 = vadd.f32 %v819_v6, %v2449_v41 }
 0x19a   : > { %v865_v3 = vadd.f32 %v835_v32, %v2448_v45  ;;  %v704_v61 = vpop.permute.xlu1 %703 }
 0x19b   : > { %879 = vst [vmem:[%s2094_s29 + $0x68] sm:$0xff] %v849_v9  ;;  %v742_v10 = vsel %vm2031_vm1, %v704_v61, 0.0 }
 0x19c   : > { %895 = vst [vmem:[%s2094_s29 + $0xe8] sm:$0xff] %v865_v3  ;;  %v832_v49 = vmul.f32 %v792_v14, %v742_v10 }
 0x19e   : > { %v862_v48 = vadd.f32 %v832_v49, %v2450_v50  ;;  %v708_v43 = vpop.permute.xlu1 %707 }
 0x19f   : > { %v744_v47 = vsel %vm2031_vm1, %v708_v43, 0.0 }
 0x1a0   : > { %892 = vst [vmem:[%s2094_s29 + $0xd0] sm:$0xff] %v862_v48  ;;  %v834_v2 = vmul.f32 %v800_v8, %v744_v47 }
 0x1a2   : > { %v864_v30 = vadd.f32 %v834_v2, %v2451_v34 }
 0x1a4   : > { %894 = vst [vmem:[%s2094_s29 + $0xe0] sm:$0xff] %v864_v30 }
 0x1a5   : > { %1135 = shalt.err (!%p1132_p6)
}
 0x1a6   : > { %s1136_s15 = scalar_lea.hbm %s2237_s21, 3840  ;;  %s1140_s19 = scalar_lea.hbm %s2291_s2, 7680 }
 0x1a7   : > { %p1137_p4 = scmp.ne.s32.totalorder %s2237_s21, %s1136_s15  ;;  %p1141_p13 = scmp.lt.s32.totalorder %s2237_s21, %s2291_s2 }
 0x1a8   : > { %p1142_p2 = scmp.lt.s32.totalorder %s1140_s19, %s1136_s15 }
 0x1a9   : > { %p1138_p7 = pnand %p1137_p4, %p1282_p9 }
 0x1aa   : > { %p1143_p8 = por %p1142_p2, %p1141_p13 }
 0x1ab   : > { %p1139_p10 = pneg %p1138_p7 }
 0x1ad   : > { %p1144_p12 = pnand %p1143_p8, %p1139_p10 }
 0x1af   : > { %1147 = shalt.err (!%p1144_p12)
}
 0x1b0   : > { %s1214_s27 = smov 128   ;;  %s1215_s29 = smov 8  }
 0x1b1   : > { %1016 = dma.vmem_to_hbm [thread:$0]  (%p1282_p9), %s2239_s30, 3840, %s2237_s21, %s897_s12, %s1214_s27, %s1214_s27, %s1215_s29  }
 0x1b2 PF: > { %s927_s25 = sand.u32 1, %s1182_s9   ;;  %p2452_p0 = scmp.ge.s32.totalorder %s1202_s14, 2 }
 0x1b3   : > { %s928_s3 = scalar_lea.sflag [#allocation4], %s927_s25 }
 0x1b4   : > { %p1023_p1 = pnand %p2452_p0, %p1289_p11 }
 0x1b6   : > { %p1024_p3 = pneg %p1023_p1 }
 0x1b8   : > { %1177 = dma.done.wait (%p1024_p3), %s928_s3, 3840  }
 0x1b9   : > { %1179 = vsyncadd (%p1024_p3), %s928_s3, 4294963456  ;;  %s18_s14 = sadd.s32 1, %s1202_s14   ;;  %s2453_s9 = smov %s1186_s10 }
 0x1ba   : > { %p15_p5 = scmp.ge.s32.totalorder %s18_s14, 4   ;;  %s2454_s10 = smov %s1190_s11 }
 0x1bb   : > { %s2455_s11 = smov %s1287_s23  ;;  %s2456_s12 = smov %s1198_s13 }
 0x1bc   : > { %s2457_s13 = smov %s2459_s17  ;;  %17 = sbr.rel (!%p15_p5) target bundleno = 6 (0x6), region = 73 }
 0x1c1   :  { %933 = vsyncpa [#allocation3], 1 }
 0x1c2   :  { %935 = vsyncpa [#allocation3 + $0x1], 1 }
 0x1c3   :  { %936 = vsyncpa [#allocation4], 1 }
 0x1c4   :  { %938 = vsyncpa [#allocation4 + $0x1], 1 }

</bundles_post_ra>
